<compile_context>
chip_gen: v7x
topology: tpu7x:2x2x1
jax: 0.10.0
libtpu: 0.0.40
codegen_flags: <defaults>
</compile_context>

<pallas_src>
import jax
import jax.numpy as jnp
from jax.experimental import pallas as pl
from jax.experimental.pallas import tpu as pltpu


def _round_up(x, m):
    return ((x + m - 1) // m) * m


def _gelu_tanh(h_f32, target_dtype):
    """GELU (tanh approx), matching nn.GELU(approximate='tanh').

    Computes the polynomial in bf16 when the downstream matmul consumes bf16
    (halves VPU/EUP + vreg pressure on v6e/v7x), otherwise in f32.
    """
    c0 = 0.7978845608028654  # sqrt(2/pi)
    c1 = 0.044715
    if target_dtype == jnp.bfloat16:
        h = h_f32.astype(jnp.bfloat16)
    else:
        h = h_f32
    g = 0.5 * h * (1.0 + jnp.tanh(c0 * (h + c1 * h * h * h)))
    return g.astype(target_dtype)


def _mlp_kernel_resident(x_ref, wfc_ref, bfc_ref, wproj_ref, bproj_ref, o_ref):
    # Full hidden dimension in one shot.  Weight BlockSpecs have a constant
    # block index, so W_fc / W_proj stay VMEM-resident across all M tiles.
    h = jnp.dot(x_ref[...], wfc_ref[...], preferred_element_type=jnp.float32)
    h = h + bfc_ref[...].astype(jnp.float32)
    g = _gelu_tanh(h, wproj_ref.dtype)
    y = jnp.dot(g, wproj_ref[...], preferred_element_type=jnp.float32)
    o_ref[...] = (y + bproj_ref[...].astype(jnp.float32)).astype(o_ref.dtype)


def _mlp_kernel_ktiled(x_ref, wfc_ref, bfc_ref, wproj_ref, bproj_ref, o_ref,
                       acc_ref):
    # Hidden dimension chunked along an "arbitrary" reduction axis; partial
    # proj matmuls accumulate into an f32 VMEM scratch.
    k = pl.program_id(1)

    @pl.when(k == 0)
    def _():
        acc_ref[...] = jnp.zeros_like(acc_ref)

    h = jnp.dot(x_ref[...], wfc_ref[...], preferred_element_type=jnp.float32)
    h = h + bfc_ref[...].astype(jnp.float32)
    g = _gelu_tanh(h, wproj_ref.dtype)
    acc_ref[...] += jnp.dot(g, wproj_ref[...],
                            preferred_element_type=jnp.float32)

    @pl.when(k == pl.num_programs(1) - 1)
    def _():
        o_ref[...] = (acc_ref[...]
                      + bproj_ref[...].astype(jnp.float32)).astype(o_ref.dtype)


def mlp_forward(x, w_fc, b_fc, w_proj, b_proj, *, tile_m=None, tile_k=None,
                vmem_budget_bytes=None):
    """Fused GPT-2 MLP forward.

    x: (B, T, C); w_fc: (C, 4C); b_fc: (4C,); w_proj: (4C, C); b_proj: (C,).
    Weights are stored (in_features, out_features).  Returns (B, T, C) in
    x.dtype.  For peak MXU throughput feed bf16 activations/weights.
    """
    B, T, C = x.shape
    H = w_fc.shape[1]  # 4 * C
    M = B * T

    x_item = jnp.dtype(x.dtype).itemsize
    w_item = jnp.dtype(w_fc.dtype).itemsize
    m_align = max(8, 32 // x_item)  # f32: 8, bf16: 16, int8/fp8: 32

    # ---- generation-aware VMEM budget (v7x: 64 MiB/TC, v5e/v6e: 128 MiB) ----
    if vmem_budget_bytes is None:
        cap = 64 * 1024 * 1024  # conservative fallback (v7x per-TC physical)
        try:
            cap = int(getattr(pltpu.get_tpu_info(), "vmem_capacity_bytes", cap))
        except Exception:
            pass
        vmem_budget_bytes = int(0.8 * cap)

    def _footprint(tm, tk):
        """Rough VMEM bytes for a (tile_m, tile_k) config, assuming
        double-buffered pipelined inputs/outputs plus f32 temps."""
        b = 0
        b += 2 * tm * C * x_item          # x tile
        b += 2 * C * tk * w_item          # W_fc chunk
        b += 2 * tk * w_item              # b_fc chunk
        b += 2 * tk * C * w_item          # W_proj chunk
        b += 2 * C * w_item               # b_proj
        b += 2 * tm * C * x_item          # out tile
        b += tm * tk * 4                  # (tm, tk) hidden intermediate (f32)
        if tk < H:
            b += tm * C * 4               # f32 accumulator scratch
        return b

    # ---- tile selection ------------------------------------------------------
    small_m = _round_up(max(M, 1), m_align)

    if tile_k is None:
        probe_tm = min(512, small_m)
        if _footprint(probe_tm, H) <= vmem_budget_bytes:
            tile_k = H                    # full weight residency
        else:
            tile_k = H
            for cand in (2048, 1024, 512, 256, 128):
                if (cand < H and H % cand == 0
                        and _footprint(probe_tm, cand) <= vmem_budget_bytes):
                    tile_k = cand
                    break
    assert H % tile_k == 0, "hidden dim must be divisible by tile_k"

    if tile_m is None:
        if M <= 256:
            tile_m = small_m
        else:
            tile_m = 128
            # Largest tile that fits the budget; prefer leaving >= 2 M tiles so
            # both v7x TensorCores get work on the "parallel" axis.
            for prefer_two_tiles in (True, False):
                chosen = None
                for cand in (1024, 512, 256, 128):
                    if _footprint(cand, tile_k) > vmem_budget_bytes:
                        continue
                    if prefer_two_tiles and M < 2 * cand:
                        continue
                    chosen = cand
                    break
                if chosen is not None:
                    tile_m = chosen
                    break
    M_pad = _round_up(M, tile_m)

    # ---- flatten / pad -------------------------------------------------------
    x2 = x.reshape(M, C)
    if M_pad != M:
        x2 = jnp.pad(x2, ((0, M_pad - M), (0, 0)))
    b_fc2 = b_fc.reshape(1, H)
    b_proj2 = b_proj.reshape(1, C)

    num_m = M_pad // tile_m
    num_k = H // tile_k

    # ---- cost estimate (advisory; reflects actual weight traffic) -----------
    weight_bytes = (w_fc.size * w_item + w_proj.size * w_item
                    + b_fc.size * jnp.dtype(b_fc.dtype).itemsize
                    + b_proj.size * jnp.dtype(b_proj.dtype).itemsize)
    weight_passes = 1 if num_k == 1 else num_m
    cost = pl.CostEstimate(
        flops=2 * M_pad * C * H * 2,            # two matmuls
        transcendentals=M_pad * H,              # tanh in GELU
        bytes_accessed=(x2.size * x_item        # x in
                        + M_pad * C * x_item    # y out
                        + weight_passes * weight_bytes),
    )

    common = dict(
        out_shape=jax.ShapeDtypeStruct((M_pad, C), x.dtype),
        compiler_params=pltpu.CompilerParams(
            dimension_semantics=(("parallel",) if num_k == 1
                                 else ("parallel", "arbitrary")),
            vmem_limit_bytes=vmem_budget_bytes,
        ),
        cost_estimate=cost,
    )

    if num_k == 1:
        out = pl.pallas_call(
            _mlp_kernel_resident,
            grid_spec=pltpu.PrefetchScalarGridSpec(
                num_scalar_prefetch=0,
                grid=(num_m,),
                in_specs=[
                    pl.BlockSpec((tile_m, C), lambda i: (i, 0)),  # x tile
                    pl.BlockSpec((C, H), lambda i: (0, 0)),       # W_fc (resident)
                    pl.BlockSpec((1, H), lambda i: (0, 0)),       # b_fc
                    pl.BlockSpec((H, C), lambda i: (0, 0)),       # W_proj (resident)
                    pl.BlockSpec((1, C), lambda i: (0, 0)),       # b_proj
                ],
                out_specs=pl.BlockSpec((tile_m, C), lambda i: (i, 0)),
            ),
            **common,
        )(x2, w_fc, b_fc2, w_proj, b_proj2)
    else:
        out = pl.pallas_call(
            _mlp_kernel_ktiled,
            grid_spec=pltpu.PrefetchScalarGridSpec(
                num_scalar_prefetch=0,
                grid=(num_m, num_k),
                in_specs=[
                    pl.BlockSpec((tile_m, C), lambda i, k: (i, 0)),   # x tile
                    pl.BlockSpec((C, tile_k), lambda i, k: (0, k)),   # W_fc chunk
                    pl.BlockSpec((1, tile_k), lambda i, k: (0, k)),   # b_fc chunk
                    pl.BlockSpec((tile_k, C), lambda i, k: (k, 0)),   # W_proj chunk
                    pl.BlockSpec((1, C),      lambda i, k: (0, 0)),   # b_proj
                ],
                out_specs=pl.BlockSpec((tile_m, C), lambda i, k: (i, 0)),
                scratch_shapes=[pltpu.VMEM((tile_m, C), jnp.float32)],
            ),
            **common,
        )(x2, w_fc, b_fc2, w_proj, b_proj2)

    if M_pad != M:
        out = out[:M]
    return out.reshape(B, T, C)


def _ref_mlp(x, w_fc, b_fc, w_proj, b_proj):
    h = jnp.einsum("btc,ch->bth", x, w_fc,
                   preferred_element_type=jnp.float32) + b_fc
    c = 0.7978845608028654
    g = 0.5 * h * (1.0 + jnp.tanh(c * (h + 0.044715 * h ** 3)))
    y = jnp.einsum("bth,hc->btc", g, w_proj,
                   preferred_element_type=jnp.float32) + b_proj
    return y.astype(x.dtype)


def _make_case(key, B, T, C, dtype=jnp.float32):
    H = 4 * C
    kx, k1, k2, k3, k4 = jax.random.split(key, 5)
    x = jax.random.normal(kx, (B, T, C), dtype=jnp.float32)
    bound_fc = 1.0 / (C ** 0.5)
    bound_proj = 1.0 / (H ** 0.5)
    w_fc = jax.random.uniform(k1, (C, H), jnp.float32, -bound_fc, bound_fc)
    b_fc = jax.random.uniform(k2, (H,), jnp.float32, -bound_fc, bound_fc)
    w_proj = jax.random.uniform(k3, (H, C), jnp.float32, -bound_proj, bound_proj)
    b_proj = jax.random.uniform(k4, (C,), jnp.float32, -bound_proj, bound_proj)
    cast = lambda a: a.astype(dtype)
    return cast(x), cast(w_fc), cast(b_fc), cast(w_proj), cast(b_proj)


if __name__ == "__main__":
    key = jax.random.PRNGKey(0)
    kc1, kc2, kc3 = jax.random.split(key, 3)

    # Case 1: small GPT-2-style config (B=2, T=8, n_embd=32 -> hidden=128),
    # f32 -> exercises the weight-resident single-pass path, tight tolerance.
    x, w_fc, b_fc, w_proj, b_proj = _make_case(kc1, 2, 8, 32)
    y = mlp_forward(x, w_fc, b_fc, w_proj, b_proj)
    jax.block_until_ready(y)
    y_ref = _ref_mlp(x, w_fc, b_fc, w_proj, b_proj)
    assert y.shape == (2, 8, 32)
    assert jnp.allclose(y, y_ref, atol=2e-5, rtol=2e-5), \
        float(jnp.max(jnp.abs(y - y_ref)))

    # Case 2: force the k-tiled (hidden-chunked + accumulator) fallback path.
    x2, w_fc2, b_fc2, w_proj2, b_proj2 = _make_case(kc2, 2, 8, 64)
    y2 = mlp_forward(x2, w_fc2, b_fc2, w_proj2, b_proj2, tile_k=128)
    jax.block_until_ready(y2)
    y2_ref = _ref_mlp(x2, w_fc2, b_fc2, w_proj2, b_proj2)
    assert jnp.allclose(y2, y2_ref, atol=2e-5, rtol=2e-5), \
        float(jnp.max(jnp.abs(y2 - y2_ref)))

    # Case 3: bf16 production dtype (bf16 GELU branch), loose mixed-precision
    # tolerance vs the f32-math reference.
    x3, w_fc3, b_fc3, w_proj3, b_proj3 = _make_case(kc3, 2, 8, 32, jnp.bfloat16)
    y3 = mlp_forward(x3, w_fc3, b_fc3, w_proj3, b_proj3)
    jax.block_until_ready(y3)
    y3_ref = _ref_mlp(x3, w_fc3, b_fc3, w_proj3, b_proj3)
    assert jnp.allclose(y3.astype(jnp.float32), y3_ref.astype(jnp.float32),
                        atol=1e-1, rtol=1e-1), \
        float(jnp.max(jnp.abs(y3.astype(jnp.float32) - y3_ref.astype(jnp.float32))))

    print("KERNEL_OK")
</pallas_src>

<mosaic_0001>
module attributes {stable_mosaic.version = 11 : i64} {
  func.func @_mlp_kernel_resident(%arg0: i32, %arg1: memref<16x32xf32, #tpu.memory_space<vmem>>, %arg2: memref<32x128xf32, #tpu.memory_space<vmem>>, %arg3: memref<1x128xf32, #tpu.memory_space<vmem>>, %arg4: memref<128x32xf32, #tpu.memory_space<vmem>>, %arg5: memref<1x32xf32, #tpu.memory_space<vmem>>, %arg6: memref<16x32xf32, #tpu.memory_space<vmem>>) attributes {dimension_semantics = [#tpu.dimension_semantics<parallel>], iteration_bounds = array<i64: 1>, scalar_prefetch = 0 : i64, scratch_operands = 0 : i64, tpu.core_type = #tpu.core_type<tc>, window_params = [{transform_indices = @transform_0, window_bounds = array<i64: 16, 32>}, {pipeline_mode = #tpu.pipeline_mode<synchronous>, transform_indices = @transform_1, window_bounds = array<i64: 32, 128>}, {pipeline_mode = #tpu.pipeline_mode<synchronous>, transform_indices = @transform_2, window_bounds = array<i64: 1, 128>}, {pipeline_mode = #tpu.pipeline_mode<synchronous>, transform_indices = @transform_3, window_bounds = array<i64: 128, 32>}, {pipeline_mode = #tpu.pipeline_mode<synchronous>, transform_indices = @transform_4, window_bounds = array<i64: 1, 32>}, {transform_indices = @transform_5, window_bounds = array<i64: 16, 32>}]} {
    %c0 = arith.constant 0 : index
    %c0_0 = arith.constant 0 : index
    %0 = vector.load %arg1[%c0, %c0_0] : memref<16x32xf32, #tpu.memory_space<vmem>>, vector<16x32xf32>
    %c0_1 = arith.constant 0 : index
    %c0_2 = arith.constant 0 : index
    %1 = vector.load %arg2[%c0_1, %c0_2] : memref<32x128xf32, #tpu.memory_space<vmem>>, vector<32x128xf32>
    %cst = arith.constant dense<0.000000e+00> : vector<16x128xf32>
    %2 = tpu.matmul %0, %1, %cst {dimension_numbers = #tpu.dot_dimension_numbers<[1], [0], [0], [1], [0, 0, 1, 1], [], []>} : vector<16x32xf32>, vector<32x128xf32>, vector<16x128xf32> -> vector<16x128xf32>
    %c0_3 = arith.constant 0 : index
    %c0_4 = arith.constant 0 : index
    %3 = vector.load %arg3[%c0_3, %c0_4] : memref<1x128xf32, #tpu.memory_space<vmem>>, vector<1x128xf32>
    %4 = vector.broadcast %3 : vector<1x128xf32> to vector<16x128xf32>
    %5 = arith.addf %2, %4 : vector<16x128xf32>
    %cst_5 = arith.constant 5.000000e-01 : f32
    %6 = vector.broadcast %cst_5 : f32 to vector<16x128xf32>
    %7 = arith.mulf %6, %5 : vector<16x128xf32>
    %cst_6 = arith.constant 4.471500e-02 : f32
    %8 = vector.broadcast %cst_6 : f32 to vector<16x128xf32>
    %9 = arith.mulf %8, %5 : vector<16x128xf32>
    %10 = arith.mulf %9, %5 : vector<16x128xf32>
    %11 = arith.mulf %10, %5 : vector<16x128xf32>
    %12 = arith.addf %5, %11 : vector<16x128xf32>
    %cst_7 = arith.constant 0.797884583 : f32
    %13 = vector.broadcast %cst_7 : f32 to vector<16x128xf32>
    %14 = arith.mulf %13, %12 : vector<16x128xf32>
    %15 = math.tanh %14 : vector<16x128xf32>
    %cst_8 = arith.constant 1.000000e+00 : f32
    %16 = vector.broadcast %cst_8 : f32 to vector<16x128xf32>
    %17 = arith.addf %16, %15 : vector<16x128xf32>
    %18 = arith.mulf %7, %17 : vector<16x128xf32>
    %c0_9 = arith.constant 0 : index
    %c0_10 = arith.constant 0 : index
    %19 = vector.load %arg4[%c0_9, %c0_10] : memref<128x32xf32, #tpu.memory_space<vmem>>, vector<128x32xf32>
    %cst_11 = arith.constant dense<0.000000e+00> : vector<16x32xf32>
    %20 = tpu.matmul %18, %19, %cst_11 {dimension_numbers = #tpu.dot_dimension_numbers<[1], [0], [0], [1], [0, 0, 1, 1], [], []>} : vector<16x128xf32>, vector<128x32xf32>, vector<16x32xf32> -> vector<16x32xf32>
    %c0_12 = arith.constant 0 : index
    %c0_13 = arith.constant 0 : index
    %21 = vector.load %arg5[%c0_12, %c0_13] : memref<1x32xf32, #tpu.memory_space<vmem>>, vector<1x32xf32>
    %22 = vector.broadcast %21 : vector<1x32xf32> to vector<16x32xf32>
    %23 = arith.addf %20, %22 : vector<16x32xf32>
    %c0_14 = arith.constant 0 : index
    %c0_15 = arith.constant 0 : index
    %24 = vector.load %arg6[%c0_14, %c0_15] : memref<16x32xf32, #tpu.memory_space<vmem>>, vector<16x32xf32>
    tpu.vector_store %arg6[%c0_14, %c0_15], %23 {strides = array<i32>} : memref<16x32xf32, #tpu.memory_space<vmem>>, vector<16x32xf32>,
    return
  }
  func.func @transform_0(%arg0: i32) -> (i32, i32) {
    %c0_i32 = arith.constant 0 : i32
    %c0_i32_0 = arith.constant 0 : i32
    return %arg0, %c0_i32 : i32, i32
  }
  func.func @transform_1(%arg0: i32) -> (i32, i32) {
    %c0_i32 = arith.constant 0 : i32
    %c0_i32_0 = arith.constant 0 : i32
    %c0_i32_1 = arith.constant 0 : i32
    return %c0_i32, %c0_i32_0 : i32, i32
  }
  func.func @transform_2(%arg0: i32) -> (i32, i32) {
    %c0_i32 = arith.constant 0 : i32
    %c0_i32_0 = arith.constant 0 : i32
    %c0_i32_1 = arith.constant 0 : i32
    return %c0_i32, %c0_i32_0 : i32, i32
  }
  func.func @transform_3(%arg0: i32) -> (i32, i32) {
    %c0_i32 = arith.constant 0 : i32
    %c0_i32_0 = arith.constant 0 : i32
    %c0_i32_1 = arith.constant 0 : i32
    return %c0_i32, %c0_i32_0 : i32, i32
  }
  func.func @transform_4(%arg0: i32) -> (i32, i32) {
    %c0_i32 = arith.constant 0 : i32
    %c0_i32_0 = arith.constant 0 : i32
    %c0_i32_1 = arith.constant 0 : i32
    return %c0_i32, %c0_i32_0 : i32, i32
  }
  func.func @transform_5(%arg0: i32) -> (i32, i32) {
    %c0_i32 = arith.constant 0 : i32
    %c0_i32_0 = arith.constant 0 : i32
    return %arg0, %c0_i32 : i32, i32
  }
}

</mosaic_0001>

<bundles_post_ra>
// kernel: tpu_custom_call.1
= control target key start
LH: loop header
LB: loop body
LE: loop exit
PB: predicated region body
PF: predicated region fallthrough
CT: control target
= control target key end

     0   :  { %vm34_vm0 = vcmask 261120   ;;  %s516_s0 = inlined_call_operand.vmem [shape: f32[16,32], index: 0, kind: input, shape index: {}]   ;;  %s517_s1 = inlined_call_operand.vmem [shape: f32[32,128], index: 1, kind: input, shape index: {}]   ;;  %s518_s2 = inlined_call_operand.vmem [shape: f32[1,128], index: 2, kind: input, shape index: {}]   ;;  %s519_s3 = inlined_call_operand.vmem [shape: f32[128,32], index: 3, kind: input, shape index: {}]   ;;  %s520_s4 = inlined_call_operand.vmem [shape: f32[1,32], index: 4, kind: input, shape index: {}]   ;;  %s521_s5 = inlined_call_operand.hbm [shape: f32[16,32], index: 5, kind: output, shape index: {}]  }
   0x1   :  { %v23_v0 = vld [vmem:[%s517_s1] sm:$0xff]  ;;  %v24_v1 = vld [vmem:[%s517_s1 + $0x8] sm:$0xff]  ;;  %v25_v2 = vld [vmem:[%s517_s1 + $0x10] sm:$0xff] }
   0x2   :  { %v324_v3 = vpack.c.bf16 %v24_v1, %v23_v0  ;;  %v26_v4 = vld [vmem:[%s517_s1 + $0x18] sm:$0xff]  ;;  %v21_v5 = vld [vmem:[%s516_s0] sm:$0xff]  ;;  %v135_v8 = vld [vmem:[%s519_s3 + $0x8] sm:$0xff] }
   0x3   :  { %v328_v6 = vpack.c.bf16 %v26_v4, %v25_v2  ;;  %286 = vmatprep.mubr.msk.f32.mxu0 %vm34_vm0, %v21_v5  ;;  %v134_v7 = vld [vmem:[%s519_s3] sm:$0xff] }
   0x4   :  { %10 = vsyncpa [#allocation3], 0  ;;  %325 = vmatprep.subr.bf16.mxu0 %v324_v3  ;;  %v332_v9 = vpack.c.bf16 %v135_v8, %v134_v7  ;;  %v22_v10 = vld [vmem:[%s516_s0 + $0x8] sm:$0xff]  ;;  %v136_v11 = vld [vmem:[%s519_s3 + $0x10] sm:$0xff]  ;;  %s395_s11 = smov [#allocation2]  }
   0x5   :  { %327 = vmatpush3.bf16.msra.mxu0 %v324_v3  ;;  %v137_v12 = vld [vmem:[%s519_s3 + $0x18] sm:$0xff]  ;;  %v138_v14 = vld [vmem:[%s519_s3 + $0x20] sm:$0xff]  ;;  %v139_v15 = vld [vmem:[%s519_s3 + $0x28] sm:$0xff]  ;;  %s239_s12 = sshll.u32 %s395_s11, 4  ;;  %s240_s12 = int_to_ptr.vmem [resolvable:$true] %s239_s12 }
   0x6   :  { %329 = vmatprep.subr.bf16.mxu0 %v328_v6  ;;  %333 = vmatprep.subr.bf16.mxu1 %v332_v9  ;;  %v336_v13 = vpack.c.bf16 %v137_v12, %v136_v11  ;;  %v340_v16 = vpack.c.bf16 %v139_v15, %v138_v14  ;;  %v140_v17 = vld [vmem:[%s519_s3 + $0x30] sm:$0xff]  ;;  %v141_v18 = vld [vmem:[%s519_s3 + $0x38] sm:$0xff]  ;;  %v142_v19 = vld [vmem:[%s519_s3 + $0x40] sm:$0xff]  ;;  %s371_s13 = scalar_lea.vmem %s240_s12, 256  ;;  %p376_p1 = scmp.lt.s32.totalorder %s240_s12, %s240_s12 }
   0x7   :  { %335 = vmatpush3.bf16.msra.mxu1 %v332_v9  ;;  %v344_v20 = vpack.c.bf16 %v141_v18, %v140_v17  ;;  %v143_v21 = vld [vmem:[%s519_s3 + $0x48] sm:$0xff]  ;;  %v144_v23 = vld [vmem:[%s519_s3 + $0x50] sm:$0xff]  ;;  %v145_v24 = vld [vmem:[%s519_s3 + $0x58] sm:$0xff]  ;;  %p372_p0 = scmp.ne.s32.totalorder %s240_s12, %s371_s13  ;;  %p377_p2 = scmp.lt.s32.totalorder %s371_s13, %s371_s13 }
   0x8   :  { %337 = vmatprep.subr.bf16.mxu1 %v336_v13  ;;  %v348_v22 = vpack.c.bf16 %v143_v21, %v142_v19  ;;  %v352_v25 = vpack.c.bf16 %v145_v24, %v144_v23  ;;  %v146_v26 = vld [vmem:[%s519_s3 + $0x60] sm:$0xff]  ;;  %v147_v27 = vld [vmem:[%s519_s3 + $0x68] sm:$0xff]  ;;  %v148_v29 = vld [vmem:[%s519_s3 + $0x70] sm:$0xff] }
   0x9   :  { %331 = vmatpush3.bf16.msra.mxu0 %v328_v6  ;;  %v356_v28 = vpack.c.bf16 %v147_v27, %v146_v26  ;;  %v149_v30 = vld [vmem:[%s519_s3 + $0x78] sm:$0xff]  ;;  %v250_v32 = vld [vmem:[%s518_s2] ss:$0 sm:$0xff]  ;;  %p378_p3 = por %p377_p2, %p376_p1 }
   0xa   :  { %v360_v31 = vpack.c.bf16 %v149_v30, %v148_v29  ;;  %v253_v55 = vld [vmem:[%s520_s4] ss:$0 sm:$0xff] }
   0xb   :  { %339 = vmatpush3.bf16.msra.mxu1 %v336_v13  ;;  %p379_p4 = pnand %p378_p3, %p372_p0 }
   0xc   :  { %287 = vmatmul.mubr.msk.f32.vlgmr.msra.gmra.mrb[0].mxu0 %vm34_vm0, %v22_v10  ;;  %341 = vmatprep.subr.bf16.mxu1 %v340_v16 }
   0xf   :  { %343 = vmatpush3.bf16.msra.mxu1 %v340_v16 }
  0x10   :  { %345 = vmatprep.subr.bf16.mxu1 %v344_v20 }
  0x13   :  { %347 = vmatpush3.bf16.msra.mxu1 %v344_v20 }
  0x14   :  { %349 = vmatprep.subr.bf16.mxu1 %v348_v22 }
  0x17   :  { %351 = vmatpush3.bf16.msra.mxu1 %v348_v22 }
  0x18   :  { %353 = vmatprep.subr.bf16.mxu1 %v352_v25 }
  0x1b   :  { %355 = vmatpush3.bf16.msra.mxu1 %v352_v25 }
  0x1c   :  { %357 = vmatprep.subr.bf16.mxu1 %v356_v28 }
  0x1f   :  { %359 = vmatpush3.bf16.msra.mxu1 %v356_v28 }
  0x20   :  { %361 = vmatprep.subr.bf16.mxu1 %v360_v31 }
  0x23   :  { %363 = vmatpush3.bf16.msra.mxu1 %v360_v31 }
  0xdf   :  { %v288_v33 = vpop.f32.mrb[0].mxu0 }
  0xe0   :  { %v113_v34 = vadd.f32 %v288_v33, %v250_v32  ;;  %v107_v35 = vpop.f32.mrb[1].mxu0 }
  0xe1   :  { %v108_v36 = vadd.f32 %v250_v32, %v107_v35 }
  0xe2   :  { %v119_v37 = vmul.f32 0.044715, %v113_v34  ;;  %v117_v52 = vmul.f32 0.5, %v113_v34 }
  0xe3   :  { %v118_v38 = vmul.f32 0.044715, %v108_v36  ;;  %v116_v50 = vmul.f32 0.5, %v108_v36 }
  0xe4   :  { %v121_v39 = vmul.f32 %v119_v37, %v113_v34 }
  0xe5   :  { %v120_v40 = vmul.f32 %v118_v38, %v108_v36 }
  0xe6   :  { %v123_v41 = vmul.f32 %v121_v39, %v113_v34 }
  0xe7   :  { %v122_v42 = vmul.f32 %v120_v40, %v108_v36 }
  0xe8   :  { %v125_v43 = vadd.f32 %v123_v41, %v113_v34 }
  0xe9   :  { %v124_v44 = vadd.f32 %v122_v42, %v108_v36 }
  0xea   :  { %v127_v45 = vmul.f32 0.7978846, %v125_v43 }
  0xeb   :  { %v126_v46 = vmul.f32 0.7978846, %v124_v44 }
  0xec   :  { %367 = vtanh.f32 %v127_v45 }
  0xed   :  { %369 = vtanh.f32 %v126_v46 }
  0xf6   :  { %v368_v47 = vpop.eup %367 }
  0xf7   :  { %v370_v48 = vpop.eup %369  ;;  %v131_v49 = vadd.f32 1.0, %v368_v47 }
  0xf8   :  { %v130_v51 = vadd.f32 1.0, %v370_v48 }
  0xf9   :  { %v133_v54 = vmul.f32 %v131_v49, %v117_v52 }
  0xfa   :  { %v132_v53 = vmul.f32 %v130_v51, %v116_v50 }
  0xfc   :  { %321 = vmatprep.mubr.f32.mxu1 %v132_v53 }
  0xfd   :  { %322 = vmatmul.mubr.f32.vlgmr.msra.gmra.mrb[0].mxu1 %v133_v54 }
 0x1d0   :  { %v323_v56 = vpop.f32.mrb[0].mxu1 }
 0x1d1   :  { %v229_v57 = vadd.f32 %v323_v56, %v253_v55  ;;  %v223_v58 = vpop.f32.mrb[1].mxu1 }
 0x1d2   :  { %v224_v59 = vadd.f32 %v253_v55, %v223_v58 }
 0x1d3   :  { %233 = vst.msk [vmem:[#allocation2 + $0x8] sm:$0xff] %vm34_vm0, %v229_v57 }
 0x1d4   :  { %232 = vst.msk [vmem:[#allocation2] sm:$0xff] %vm34_vm0, %v224_v59 }
 0x1d5   :  { %382 = shalt.err (!%p379_p4)
}
 0x1d6   :  { %s383_s15 = scalar_lea.hbm %s521_s5, 256 }
 0x1d7   :  { %p384_p5 = scmp.ne.s32.totalorder %s521_s5, %s383_s15  ;;  %p387_p6 = scmp.lt.u32.totalorder %s383_s15, %s521_s5 }
 0x1d9   :  { %p389_p7 = pnand %p387_p6, %p384_p5 }
 0x1db   :  { %392 = shalt.err (!%p389_p7)
}
 0x1dc   :  { %s396_s19 = smov 128   ;;  %s397_s20 = smov 8  }
 0x1dd   :  { %245 = dma.vmem_to_hbm [thread:$0]  %s240_s12, 256, %s521_s5, [#allocation3], %s396_s19, %s396_s19, %s397_s20  }
 0x1de   :  { %393 = dma.done.wait [#allocation3], 256  }
 0x1df   :  { %394 = vsyncadd [#allocation3], 4294967040 }
 0x1e0   :  { %249 = vsyncpa [#allocation3], 1 }

</bundles_post_ra>
